<compile_context>
chip_gen: v7x
topology: tpu7x:2x2x1
jax: 0.10.0
libtpu: 0.0.40
codegen_flags: <defaults>
</compile_context>

<pallas_src>
import jax
import jax.numpy as jnp
from jax.experimental import pallas as pl
from jax.experimental.pallas import tpu as pltpu

_LANES = 128            # lane-dense last dim (full vreg lane width)
_MAX_BLOCK_ROWS = 1024  # (1024, 128) f32 tile = 512 KiB; x4 (dbl-buffered in+out) = 2 MiB VMEM


def _identity_kernel(x_ref, o_ref):
    # Whole-tile copy: the base module applies no transformation.
    o_ref[...] = x_ref[...]


def _base_vae_forward(x: jnp.ndarray) -> jnp.ndarray:
    """Pass-through 'forward' of the abstract BaseVAE, routed through a tiled
    Pallas TPU copy.  Input may be any shape (NCHW expected); output has
    identical shape/dtype."""
    orig_shape = x.shape
    total = 1
    for d in orig_shape:
        total *= d

    flat = x.reshape(total)

    # Lane-dense layout: pad the flat length so it reshapes to (rows, 128)
    # with rows a multiple of the block row count -> no partial blocks, no
    # masked (vst.msk) stores, regardless of the original W / channel sizes.
    rows = pl.cdiv(total, _LANES)
    rows = ((rows + 7) // 8) * 8                       # sublane granularity
    block_rows = min(_MAX_BLOCK_ROWS, rows)
    rows = ((rows + block_rows - 1) // block_rows) * block_rows
    padded = rows * _LANES
    if padded != total:
        flat = jnp.pad(flat, (0, padded - total))
    x2d = flat.reshape(rows, _LANES)

    grid = (rows // block_rows,)
    out2d = pl.pallas_call(
        _identity_kernel,
        out_shape=jax.ShapeDtypeStruct((rows, _LANES), x2d.dtype),
        grid=grid,
        in_specs=[pl.BlockSpec((block_rows, _LANES), lambda i: (i, 0))],
        out_specs=pl.BlockSpec((block_rows, _LANES), lambda i: (i, 0)),
        # Pure pass-through: alias input 0 with output 0 so no second HBM
        # buffer is written when the (padded) input buffer can be donated.
        input_output_aliases={0: 0},
        compiler_params=pltpu.CompilerParams(
            # "parallel" -> v7x shards the copy across its 2 TensorCores;
            # harmless on v5e/v6e (single TC).
            dimension_semantics=("parallel",),
        ),
    )(x2d)

    return out2d.reshape(padded)[:total].reshape(orig_shape)


base_vae_forward = jax.jit(_base_vae_forward)


if __name__ == "__main__":
    key = jax.random.PRNGKey(0)
    # Small NCHW input consistent with a VAE image input.
    x = jax.random.normal(key, (2, 4, 16, 16), dtype=jnp.float32)

    y = base_vae_forward(x)
    jax.block_until_ready(y)

    # Sanity: base-class forward is a pass-through (no params, no compute).
    assert y.shape == x.shape and y.dtype == x.dtype
    assert bool(jnp.allclose(y, x))

    print("KERNEL_OK")
</pallas_src>

<mosaic_0001>
module attributes {stable_mosaic.version = 11 : i64} {
  func.func @_identity_kernel(%arg0: i32, %arg1: memref<16x128xf32, #tpu.memory_space<vmem>>, %arg2: memref<16x128xf32, #tpu.memory_space<vmem>>) attributes {dimension_semantics = [#tpu.dimension_semantics<parallel>], iteration_bounds = array<i64: 1>, scalar_prefetch = 0 : i64, scratch_operands = 0 : i64, tpu.core_type = #tpu.core_type<tc>, window_params = [{transform_indices = @transform_0, window_bounds = array<i64: 16, 128>}, {transform_indices = @transform_1, window_bounds = array<i64: 16, 128>}]} {
    %c0 = arith.constant 0 : index
    %c0_0 = arith.constant 0 : index
    %0 = vector.load %arg1[%c0, %c0_0] : memref<16x128xf32, #tpu.memory_space<vmem>>, vector<16x128xf32>
    %c0_1 = arith.constant 0 : index
    %c0_2 = arith.constant 0 : index
    %1 = vector.load %arg2[%c0_1, %c0_2] : memref<16x128xf32, #tpu.memory_space<vmem>>, vector<16x128xf32>
    tpu.vector_store %arg2[%c0_1, %c0_2], %0 {strides = array<i32>} : memref<16x128xf32, #tpu.memory_space<vmem>>, vector<16x128xf32>,
    return
  }
  func.func @transform_0(%arg0: i32) -> (i32, i32) {
    %c0_i32 = arith.constant 0 : i32
    %c0_i32_0 = arith.constant 0 : i32
    return %arg0, %c0_i32 : i32, i32
  }
  func.func @transform_1(%arg0: i32) -> (i32, i32) {
    %c0_i32 = arith.constant 0 : i32
    %c0_i32_0 = arith.constant 0 : i32
    return %arg0, %c0_i32 : i32, i32
  }
}

</mosaic_0001>

<bundles_post_ra>
// kernel: _base_vae_forward.1
= control target key start
LH: loop header
LB: loop body
LE: loop exit
PB: predicated region body
PF: predicated region fallthrough
CT: control target
= control target key end

     0   :  { %s38_s0 = inlined_call_operand.vmem [shape: f32[16,128], index: 0, kind: input, shape index: {}, may-alias: {0,1}]   ;;  %s39_s1 = inlined_call_operand.vmem [shape: f32[16,128], index: 1, kind: output, shape index: {}, may-alias: {0,1}]  }
   0x1   :  { %v8_v0 = vld [vmem:[%s38_s0] sm:$0xff]  ;;  %v9_v1 = vld [vmem:[%s38_s0 + $0x8] sm:$0xff] }
   0x2   :  { %10 = vst [vmem:[%s39_s1] sm:$0xff] %v8_v0  ;;  %11 = vst [vmem:[%s39_s1 + $0x8] sm:$0xff] %v9_v1 }

</bundles_post_ra>
